<compile_context>
chip_gen: v7x
topology: tpu7x:2x2x1
jax: 0.10.0
libtpu: 0.0.40
codegen_flags: <defaults>
</compile_context>

<pallas_src>
import functools

import jax
import jax.numpy as jnp
from jax import lax
from jax.experimental import pallas as pl
from jax.experimental.pallas import tpu as pltpu


def _expand_mask(mask, m, n_cols):
    """Expand per-component mask (rows, n_comp) -> per-column (rows, n_comp*m).

    Uses a tiny MXU dot against an iota-built 0/1 expansion matrix
    E[r, j] = 1 iff r*m <= j < (r+1)*m  (C-major / m-minor column order,
    matching the weight fold).  Avoids lane-axis reshapes / integer division /
    gathers; exact for 0/1 masks.
    """
    n_comp = mask.shape[-1]
    row = lax.broadcasted_iota(jnp.int32, (n_comp, n_cols), 0)
    col = lax.broadcasted_iota(jnp.int32, (n_comp, n_cols), 1)
    expand = jnp.logical_and(col >= row * m, col < (row + 1) * m).astype(mask.dtype)
    return jnp.dot(mask, expand, preferred_element_type=jnp.float32)


def _lc_kernel_masked(x_ref, a_ref, b_ref, mask_ref, o_ref, acc_ref, *, m):
    # x: (bb, d_in), a: (d_in, cm_blk), b: (cm_blk, d_out), mask: (bb, c_blk)
    ki = pl.program_id(2)

    @pl.when(ki == 0)
    def _init():
        acc_ref[...] = jnp.zeros_like(acc_ref)

    inner = jnp.dot(x_ref[...], a_ref[...], preferred_element_type=jnp.float32)
    # Mask applied on the f32 `inner` (no bf16 VPU needed -> v5e-safe).
    mask_exp = _expand_mask(mask_ref[...], m, inner.shape[-1])
    inner = inner * mask_exp
    # Cast the masked activation to the weight dtype for the second MXU dot,
    # accumulate in f32.
    acc_ref[...] += jnp.dot(inner.astype(b_ref.dtype), b_ref[...],
                            preferred_element_type=jnp.float32)

    @pl.when(ki == pl.num_programs(2) - 1)
    def _finalize():
        o_ref[...] = acc_ref[...].astype(o_ref.dtype)


def _lc_kernel_nomask(x_ref, a_ref, b_ref, o_ref, acc_ref):
    ki = pl.program_id(2)

    @pl.when(ki == 0)
    def _init():
        acc_ref[...] = jnp.zeros_like(acc_ref)

    inner = jnp.dot(x_ref[...], a_ref[...], preferred_element_type=jnp.float32)
    acc_ref[...] += jnp.dot(inner.astype(b_ref.dtype), b_ref[...],
                            preferred_element_type=jnp.float32)

    @pl.when(ki == pl.num_programs(2) - 1)
    def _finalize():
        o_ref[...] = acc_ref[...].astype(o_ref.dtype)


def fold_linear_component_weights(A, B, compute_dtype=jnp.bfloat16):
    """One-time weight prep, hoisted out of the per-call forward path.

    A: (i, C, d_in, m) -> (i, d_in, C*m);  B: (i, C, m, d_out) -> (i, C*m, d_out)
    (C-major / m-minor column order).  Cast to the MXU-native compute dtype here
    so the per-forward HBM weight traffic is already halved.
    """
    n_inst, C, d_in, m = A.shape
    d_out = B.shape[-1]
    A_cat = jnp.transpose(A, (0, 2, 1, 3)).reshape(n_inst, d_in, C * m)
    B_cat = jnp.reshape(B, (n_inst, C * m, d_out))
    return A_cat.astype(compute_dtype), B_cat.astype(compute_dtype)


@functools.partial(jax.jit, static_argnames=("m", "block_b", "block_cm"))
def linear_component_forward(x, A_cat, B_cat, topk_mask=None, *, m,
                             block_b=None, block_cm=None):
    """x: (b, i, d_in); A_cat: (i, d_in, C*m); B_cat: (i, C*m, d_out);
    topk_mask: (b, i, C) or None.  Returns (b, i, d_out) in x.dtype."""
    b, n_inst, d_in = x.shape
    _, _, Cm = A_cat.shape
    d_out = B_cat.shape[-1]
    compute_dtype = A_cat.dtype

    block_b = b if block_b is None else block_b
    block_cm = Cm if block_cm is None else block_cm
    if b % block_b != 0 or Cm % block_cm != 0 or block_cm % m != 0:
        raise ValueError("block_b must divide b; block_cm must divide Cm and be a multiple of m")
    nb = b // block_b
    nk = Cm // block_cm
    block_c = block_cm // m

    # Instance-major activation layouts: the grid-indexed singleton dim is
    # leading, last-two block dims stay aligned with the (8,128) rule.
    x_t = jnp.transpose(x, (1, 0, 2)).astype(compute_dtype)          # (i, b, d_in)

    grid = (n_inst, nb, nk)
    x_spec = pl.BlockSpec((None, block_b, d_in), lambda i, bi, ki: (i, bi, 0))
    a_spec = pl.BlockSpec((None, d_in, block_cm), lambda i, bi, ki: (i, 0, ki))
    b_spec = pl.BlockSpec((None, block_cm, d_out), lambda i, bi, ki: (i, ki, 0))
    o_spec = pl.BlockSpec((None, block_b, d_out), lambda i, bi, ki: (i, bi, 0))
    out_shape = jax.ShapeDtypeStruct((n_inst, b, d_out), x.dtype)
    scratch = [pltpu.VMEM((block_b, d_out), jnp.float32)]
    params = pltpu.CompilerParams(
        dimension_semantics=("parallel", "parallel", "arbitrary"),
        vmem_limit_bytes=64 * 1024 * 1024,
    )

    if topk_mask is None:
        out_t = pl.pallas_call(
            _lc_kernel_nomask,
            out_shape=out_shape,
            grid=grid,
            in_specs=[x_spec, a_spec, b_spec],
            out_specs=o_spec,
            scratch_shapes=scratch,
            compiler_params=params,
        )(x_t, A_cat, B_cat)
    else:
        # Un-expanded per-component mask: only (b, i, C) bytes of HBM traffic;
        # the m-expansion happens inside the kernel.
        mask_t = jnp.transpose(topk_mask, (1, 0, 2)).astype(compute_dtype)  # (i, b, C)
        mask_spec = pl.BlockSpec((None, block_b, block_c), lambda i, bi, ki: (i, bi, ki))
        out_t = pl.pallas_call(
            functools.partial(_lc_kernel_masked, m=m),
            out_shape=out_shape,
            grid=grid,
            in_specs=[x_spec, a_spec, b_spec, mask_spec],
            out_specs=o_spec,
            scratch_shapes=scratch,
            compiler_params=params,
        )(x_t, A_cat, B_cat, mask_t)

    return jnp.transpose(out_t, (1, 0, 2))                            # (b, i, d_out)


def _reference(x, A, B, topk_mask=None):
    inner = jnp.einsum("bid,icdm->bicm", x, A)
    if topk_mask is not None:
        inner = inner * topk_mask[..., None]
    comp = jnp.einsum("bicm,icmo->bico", inner, B)
    return comp.sum(axis=2)


if __name__ == "__main__":
    # Shapes implied by the module: batch=2, n_instances=3, C=4, d_in=16, d_out=8
    batch, n_instances, C, d_in, d_out = 2, 3, 4, 16, 8
    m = min(d_in, d_out) + 1  # module default m = 9

    key = jax.random.PRNGKey(0)
    kx, ka, kb, kmask = jax.random.split(key, 4)
    x = jax.random.normal(kx, (batch, n_instances, d_in), dtype=jnp.float32)
    A = jax.random.normal(ka, (n_instances, C, d_in, m), dtype=jnp.float32) * 0.02
    B = jax.random.normal(kb, (n_instances, C, m, d_out), dtype=jnp.float32) * 0.02
    topk_mask = (jax.random.uniform(kmask, (batch, n_instances, C)) > 0.5).astype(
        jnp.float32
    )

    ref_masked = _reference(x, A, B, topk_mask)
    ref_nomask = _reference(x, A, B, None)

    # f32 compute path: tight check of the fold / indexing / mask semantics.
    A32, B32 = fold_linear_component_weights(A, B, compute_dtype=jnp.float32)
    out32 = linear_component_forward(x, A32, B32, topk_mask, m=m)
    jax.block_until_ready(out32)
    assert out32.shape == (batch, n_instances, d_out)
    assert jnp.allclose(out32, ref_masked, rtol=1e-4, atol=1e-5), "f32 masked mismatch"

    # bf16 compute path (production configuration; f32 accumulation).
    A16, B16 = fold_linear_component_weights(A, B, compute_dtype=jnp.bfloat16)
    out16 = linear_component_forward(x, A16, B16, topk_mask, m=m)
    jax.block_until_ready(out16)
    assert jnp.allclose(out16, ref_masked, rtol=5e-2, atol=2e-3), "bf16 masked mismatch"

    # topk_mask=None path (forward(x) with no mask).
    out16_nm = linear_component_forward(x, A16, B16, None, m=m)
    jax.block_until_ready(out16_nm)
    assert jnp.allclose(out16_nm, ref_nomask, rtol=5e-2, atol=2e-3), "bf16 nomask mismatch"

    print("KERNEL_OK")
</pallas_src>

<mosaic_0001>
module attributes {stable_mosaic.version = 11 : i64} {
  func.func @_lc_kernel_masked(%arg0: i32, %arg1: i32, %arg2: i32, %arg3: memref<1x2x16xf32, #tpu.memory_space<vmem>>, %arg4: memref<1x16x36xf32, #tpu.memory_space<vmem>>, %arg5: memref<1x36x8xf32, #tpu.memory_space<vmem>>, %arg6: memref<1x2x4xf32, #tpu.memory_space<vmem>>, %arg7: memref<1x2x8xf32, #tpu.memory_space<vmem>>, %arg8: memref<2x8xf32, #tpu.memory_space<vmem>>) attributes {dimension_semantics = [#tpu.dimension_semantics<parallel>, #tpu.dimension_semantics<parallel>, #tpu.dimension_semantics<arbitrary>], iteration_bounds = array<i64: 3, 1, 1>, scalar_prefetch = 0 : i64, scratch_operands = 1 : i64, tpu.core_type = #tpu.core_type<tc>, window_params = [{transform_indices = @transform_0, window_bounds = array<i64: 1, 2, 16>}, {transform_indices = @transform_1, window_bounds = array<i64: 1, 16, 36>}, {transform_indices = @transform_2, window_bounds = array<i64: 1, 36, 8>}, {transform_indices = @transform_3, window_bounds = array<i64: 1, 2, 4>}, {transform_indices = @transform_4, window_bounds = array<i64: 1, 2, 8>}]} {
    %c0_i32 = arith.constant 0 : i32
    %0 = arith.cmpi eq, %arg2, %c0_i32 : i32
    %1 = arith.extui %0 : i1 to i32
    %c0_i32_0 = arith.constant 0 : i32
    %2 = arith.cmpi ne, %1, %c0_i32_0 : i32
    scf.if %2 {
      %cst_21 = arith.constant 0.000000e+00 : f32
      %34 = vector.broadcast %cst_21 : f32 to vector<2x8xf32>
      %c0_22 = arith.constant 0 : index
      %c0_23 = arith.constant 0 : index
      %35 = vector.load %arg8[%c0_22, %c0_23] : memref<2x8xf32, #tpu.memory_space<vmem>>, vector<2x8xf32>
      tpu.vector_store %arg8[%c0_22, %c0_23], %34 {strides = array<i32>} : memref<2x8xf32, #tpu.memory_space<vmem>>, vector<2x8xf32>,
    } else {
    }
    %c0 = arith.constant 0 : index
    %c0_1 = arith.constant 0 : index
    %c0_2 = arith.constant 0 : index
    %3 = vector.load %arg3[%c0, %c0_1, %c0_2] : memref<1x2x16xf32, #tpu.memory_space<vmem>>, vector<1x2x16xf32>
    %4 = vector.shape_cast %3 : vector<1x2x16xf32> to vector<2x16xf32>
    %c0_3 = arith.constant 0 : index
    %c0_4 = arith.constant 0 : index
    %c0_5 = arith.constant 0 : index
    %5 = vector.load %arg4[%c0_3, %c0_4, %c0_5] : memref<1x16x36xf32, #tpu.memory_space<vmem>>, vector<1x16x36xf32>
    %6 = vector.shape_cast %5 : vector<1x16x36xf32> to vector<16x36xf32>
    %cst = arith.constant dense<0.000000e+00> : vector<2x36xf32>
    %7 = tpu.matmul %4, %6, %cst {dimension_numbers = #tpu.dot_dimension_numbers<[1], [0], [0], [1], [0, 0, 1, 1], [], []>} : vector<2x16xf32>, vector<16x36xf32>, vector<2x36xf32> -> vector<2x36xf32>
    %c0_6 = arith.constant 0 : index
    %c0_7 = arith.constant 0 : index
    %c0_8 = arith.constant 0 : index
    %8 = vector.load %arg6[%c0_6, %c0_7, %c0_8] : memref<1x2x4xf32, #tpu.memory_space<vmem>>, vector<1x2x4xf32>
    %9 = vector.shape_cast %8 : vector<1x2x4xf32> to vector<2x4xf32>
    %10 = tpu.iota {dimensions = array<i32: 0>} : vector<4x36xi32>
    %11 = tpu.iota {dimensions = array<i32: 1>} : vector<4x36xi32>
    %c9_i32 = arith.constant 9 : i32
    %12 = vector.broadcast %c9_i32 : i32 to vector<4x36xi32>
    %13 = arith.muli %10, %12 : vector<4x36xi32>
    %14 = arith.cmpi sge, %11, %13 : vector<4x36xi32>
    %c1_i32 = arith.constant 1 : i32
    %15 = vector.broadcast %c1_i32 : i32 to vector<4x36xi32>
    %16 = arith.addi %10, %15 : vector<4x36xi32>
    %c9_i32_9 = arith.constant 9 : i32
    %17 = vector.broadcast %c9_i32_9 : i32 to vector<4x36xi32>
    %18 = arith.muli %16, %17 : vector<4x36xi32>
    %19 = arith.cmpi slt, %11, %18 : vector<4x36xi32>
    %20 = arith.andi %14, %19 : vector<4x36xi1>
    %21 = arith.extui %20 : vector<4x36xi1> to vector<4x36xi32>
    %22 = arith.sitofp %21 : vector<4x36xi32> to vector<4x36xf32>
    %cst_10 = arith.constant dense<0.000000e+00> : vector<2x36xf32>
    %23 = tpu.matmul %9, %22, %cst_10 {dimension_numbers = #tpu.dot_dimension_numbers<[1], [0], [0], [1], [0, 0, 1, 1], [], []>} : vector<2x4xf32>, vector<4x36xf32>, vector<2x36xf32> -> vector<2x36xf32>
    %24 = arith.mulf %7, %23 : vector<2x36xf32>
    %c0_11 = arith.constant 0 : index
    %c0_12 = arith.constant 0 : index
    %25 = vector.load %arg8[%c0_11, %c0_12] : memref<2x8xf32, #tpu.memory_space<vmem>>, vector<2x8xf32>
    %c0_13 = arith.constant 0 : index
    %c0_14 = arith.constant 0 : index
    %c0_15 = arith.constant 0 : index
    %26 = vector.load %arg5[%c0_13, %c0_14, %c0_15] : memref<1x36x8xf32, #tpu.memory_space<vmem>>, vector<1x36x8xf32>
    %27 = vector.shape_cast %26 : vector<1x36x8xf32> to vector<36x8xf32>
    %cst_16 = arith.constant dense<0.000000e+00> : vector<2x8xf32>
    %28 = tpu.matmul %24, %27, %cst_16 {dimension_numbers = #tpu.dot_dimension_numbers<[1], [0], [0], [1], [0, 0, 1, 1], [], []>} : vector<2x36xf32>, vector<36x8xf32>, vector<2x8xf32> -> vector<2x8xf32>
    %29 = arith.addf %25, %28 : vector<2x8xf32>
    %c0_17 = arith.constant 0 : index
    %c0_18 = arith.constant 0 : index
    %30 = vector.load %arg8[%c0_17, %c0_18] : memref<2x8xf32, #tpu.memory_space<vmem>>, vector<2x8xf32>
    tpu.vector_store %arg8[%c0_17, %c0_18], %29 {strides = array<i32>} : memref<2x8xf32, #tpu.memory_space<vmem>>, vector<2x8xf32>,
    %c0_i32_19 = arith.constant 0 : i32
    %31 = arith.cmpi eq, %arg2, %c0_i32_19 : i32
    %32 = arith.extui %31 : i1 to i32
    %c0_i32_20 = arith.constant 0 : i32
    %33 = arith.cmpi ne, %32, %c0_i32_20 : i32
    scf.if %33 {
      %c0_21 = arith.constant 0 : index
      %c0_22 = arith.constant 0 : index
      %34 = vector.load %arg8[%c0_21, %c0_22] : memref<2x8xf32, #tpu.memory_space<vmem>>, vector<2x8xf32>
      %c0_23 = arith.constant 0 : index
      %c0_24 = arith.constant 0 : index
      %c0_25 = arith.constant 0 : index
      %35 = vector.load %arg7[%c0_23, %c0_24, %c0_25] : memref<1x2x8xf32, #tpu.memory_space<vmem>>, vector<1x2x8xf32>
      %36 = vector.shape_cast %35 : vector<1x2x8xf32> to vector<2x8xf32>
      %37 = vector.shape_cast %34 : vector<2x8xf32> to vector<1x2x8xf32>
      tpu.vector_store %arg7[%c0_23, %c0_24, %c0_25], %37 {strides = array<i32>} : memref<1x2x8xf32, #tpu.memory_space<vmem>>, vector<1x2x8xf32>,
    } else {
    }
    return
  }
  func.func @transform_0(%arg0: i32, %arg1: i32, %arg2: i32) -> (i32, i32, i32) {
    %c0_i32 = arith.constant 0 : i32
    %c0_i32_0 = arith.constant 0 : i32
    return %arg0, %arg1, %c0_i32 : i32, i32, i32
  }
  func.func @transform_1(%arg0: i32, %arg1: i32, %arg2: i32) -> (i32, i32, i32) {
    %c0_i32 = arith.constant 0 : i32
    %c0_i32_0 = arith.constant 0 : i32
    return %arg0, %c0_i32, %arg2 : i32, i32, i32
  }
  func.func @transform_2(%arg0: i32, %arg1: i32, %arg2: i32) -> (i32, i32, i32) {
    %c0_i32 = arith.constant 0 : i32
    %c0_i32_0 = arith.constant 0 : i32
    return %arg0, %arg2, %c0_i32 : i32, i32, i32
  }
  func.func @transform_3(%arg0: i32, %arg1: i32, %arg2: i32) -> (i32, i32, i32) {
    %c0_i32 = arith.constant 0 : i32
    return %arg0, %arg1, %arg2 : i32, i32, i32
  }
  func.func @transform_4(%arg0: i32, %arg1: i32, %arg2: i32) -> (i32, i32, i32) {
    %c0_i32 = arith.constant 0 : i32
    %c0_i32_0 = arith.constant 0 : i32
    return %arg0, %arg1, %c0_i32 : i32, i32, i32
  }
}

</mosaic_0001>

<bundles_post_ra>
// kernel: linear_component_forward.1
= control target key start
LH: loop header
LB: loop body
LE: loop exit
PB: predicated region body
PF: predicated region fallthrough
CT: control target
= control target key end

     0   :  { %s1529_s0 = inlined_call_operand.hbm [shape: f32[3,2,16], index: 0, kind: input, shape index: {}]   ;;  %s1530_s1 = inlined_call_operand.hbm [shape: f32[3,16,36], index: 1, kind: input, shape index: {}]   ;;  %s1531_s2 = inlined_call_operand.hbm [shape: f32[3,36,8], index: 2, kind: input, shape index: {}]   ;;  %s1532_s3 = inlined_call_operand.hbm [shape: f32[3,2,4], index: 3, kind: input, shape index: {}]   ;;  %s1533_s4 = inlined_call_operand.hbm [shape: f32[3,2,8], index: 4, kind: output, shape index: {}]  }
   0x1   :  { %1542 = sst [smem:[#allocation19_spill]] %s1530_s1 }
   0x2   :  { %9 = vsyncpa [#allocation4], 0 }
   0x3   :  { %11 = vsyncpa [#allocation4 + $0x1], 0 }
   0x4   :  { %12 = vsyncpa [#allocation7], 0 }
   0x5   :  { %14 = vsyncpa [#allocation7 + $0x1], 0 }
   0x6   :  { %15 = vsyncpa [#allocation10], 0 }
   0x7   :  { %17 = vsyncpa [#allocation10 + $0x1], 0 }
   0x8   :  { %18 = vsyncpa [#allocation5], 0 }
   0x9   :  { %20 = vsyncpa [#allocation5 + $0x1], 0  ;;  %s1207_s15 = smov 0   ;;  %s1209_s16 = smov 0  }
   0xa   :  { %s1211_s17 = smov 0   ;;  %s1213_s18 = smov 0  }
   0xb   :  { %s1215_s19 = smov 0   ;;  %s1217_s20 = smov 0  }
   0xc LB: > { %1543 = sst [smem:[#allocation16_spill]] %s1158_s17  ;;  %s1238_s21 = sadd.s32 4294967295, %s1170_s20   ;;  %s1170_s20 = sphi %s1217_s20, %s26_s20   ;;  %s1166_s19 = sphi %s1215_s19, %s1568_s19   ;;  %s1162_s18 = sphi %s1213_s18, %s1567_s18   ;;  %s1158_s17 = sphi %s1211_s17, %s1563_s17   ;;  %s1154_s16 = sphi %s1209_s16, %s1566_s16   ;;  %s1150_s15 = sphi %s1207_s15, %s1565_s15  }
   0xd   : > { %s803_s22 = sadd.s32 4294967294, %s1170_s20   ;;  %s45_s23 = sadd.s32 1, %s1166_s19 }
   0xe   : > { %s54_s24 = sadd.s32 1, %s1158_s17  ;;  %p47_p0 = scmp.ge.s32.totalorder %s45_s23, 3 }
   0xf   : > { %p61_p1 = scmp.ne.s32.totalorder %s1158_s17, %s1154_s16  ;;  %p62_p2 = scmp.eq.s32.totalorder %s1170_s20, 0 }
  0x10   : > { %p67_p3 = scmp.ne.s32.totalorder %s1154_s16, %s1150_s15  ;;  %s1570_s23 = smov (%p47_p0, %s45_s23), 0 }
  0x11   : > { %1544 = sst [smem:[#allocation17_spill]] %s1570_s23  ;;  %p1250_p4 = por %p62_p2, %p61_p1 }
  0x12   : > { %p68_p5 = scmp.eq.s32.totalorder %s1238_s21, 0  ;;  %s49_s26 = ssub.s32 %s1166_s19, %s1570_s23 }
  0x13   : > { %p179_p6 = scmp.eq.s32.totalorder %s1238_s21, 2  ;;  %p52_p7 = scmp.eq.s32.totalorder %s49_s26, 0 }
  0x14   : > { %p1258_p8 = por %p68_p5, %p67_p3  ;;  %p185_p10 = scmp.eq.s32.totalorder %s803_s22, 2 }
  0x15   : > { %p1262_p9 = por %p179_p6, %p61_p1  ;;  %p905_p12 = scmp.lt.s32.totalorder %s1170_s20, 3 }
  0x16   : > { %s1546_s27 = scalar_select %p1258_p8, 1, 0 }
  0x17   : > { %s1547_s28 = scalar_select %p1262_p9, 1, 0 }
  0x18   : > { %s1267_s29 = scalar_select %p52_p7, %s1158_s17, %s54_s24  }
  0x19   : > { %p1269_p11 = por %p185_p10, %p67_p3  ;;  %s1275_s5 = sand.u32 1, %s1158_s17  }
  0x1a   : > { %1548 = sst [smem:[#allocation18_spill]] %s1267_s29  ;;  %s224_s6 = sand.u32 1, %s1170_s20  }
  0x1b   : > { %s1549_s30 = scalar_select %p1269_p11, 1, 0 }
  0x1c   : > { %s808_s7 = sshll.u32 %s1275_s5, 4  ;;  %p1281_p13 = pnand %p905_p12, %p1250_p4 }
  0x1d   : > { %s829_s9 = sshll.u32 %s1166_s19, 8  ;;  %s1551_s1 = sld [smem:[#allocation19_spill]] }
  0x1e   : > { %s1550_s8 = scalar_select %p1281_p13, 1, 0 }
  0x1f   : > { %s228_s13 = scalar_lea.vmem [#allocation6], %s808_s7  ;;  %s1293_s22 = scalar_lea.sflag [#allocation7], %s224_s6 }
  0x20   : > { %s236_s14 = sshll.u32 %s228_s13, 4  ;;  %p1299_p1 = pneg %p1281_p13  ;;  %s1291_s14 = int_to_ptr.vmem [resolvable:$true] %s236_s14 }
  0x23   : > { %s1289_s12 = scalar_lea.hbm %s1551_s1, %s829_s9  ;;  %s965_s7 = scalar_lea.hbm %s1551_s1, 768 }
  0x24   : > { %s960_s24 = scalar_lea.hbm %s1289_s12, 256  ;;  %p966_p4 = scmp.lt.u32.totalorder %s1289_s12, %s1551_s1 }
  0x25   : > { %p961_p0 = scmp.ne.s32.totalorder %s1289_s12, %s960_s24  ;;  %p967_p5 = scmp.lt.u32.totalorder %s965_s7, %s960_s24 }
  0x26   : > { %p969_p7 = scmp.lt.u32.totalorder %s960_s24, %s1289_s12 }
  0x27   : > { %p963_p2 = pnand %p1299_p1, %p961_p0  ;;  %p968_p6 = por %p967_p5, %p966_p4 }
  0x29   : > { %p964_p3 = pneg %p963_p2  ;;  %p970_p10 = por %p969_p7, %p968_p6 }
  0x2b   : > { %p971_p12 = pnand %p970_p10, %p964_p3 }
  0x2d   : > { %974 = shalt.err (!%p971_p12)
}
  0x2e   : > { %s975_s6 = scalar_lea.vmem %s1291_s14, 256  ;;  %s1172_s13 = smov [#allocation6]  }
  0x2f   : > { %p976_p0 = scmp.ne.s32.totalorder %s1291_s14, %s975_s6  ;;  %s980_s26 = sshll.u32 %s1172_s13, 4  ;;  %s981_s26 = int_to_ptr.vmem [resolvable:$false] %s980_s26 }
  0x30   : > { %s982_s9 = scalar_lea.vmem %s981_s26, 512  ;;  %p983_p9 = scmp.lt.s32.totalorder %s1291_s14, %s981_s26 }
  0x31   : > { %p978_p2 = pnand %p976_p0, %p1299_p1  ;;  %p984_p8 = scmp.lt.s32.totalorder %s982_s9, %s975_s6 }
  0x33   : > { %p979_p11 = pneg %p978_p2  ;;  %p985_p4 = por %p984_p8, %p983_p9 }
  0x35   : > { %p986_p5 = pnand %p985_p4, %p979_p11 }
  0x37   : > { %989 = shalt.err (!%p986_p5)
}
  0x38   : > { %s1536_s24 = smov 128   ;;  %s1537_s7 = smov 8  }
  0x39   : > { %894 = dma.hbm_to_vmem [thread:$0]  (!%p1281_p13), %s1289_s12, 256, %s1291_s14, %s1293_s22, %s1536_s24, %s1536_s24, %s1537_s7  }
  0x3a   : > { %p814_p8 = scmp.ge.s32.totalorder %s1170_s20, 1  ;;  %p287_p9 = scmp.lt.s32.totalorder %s1170_s20, 4 }
  0x3b   : > { %s806_s11 = sshll.u32 %s1275_s5, 1  ;;  %s1539_s6 = sshll.u32 %s1166_s19, 5 }
  0x3c   : > { %p1328_p11 = pnand %p814_p8, %p287_p9  ;;  %s1339_s9 = scalar_lea.hbm %s1529_s0, %s1539_s6 }
  0x3d   : > { %s209_s12 = scalar_lea.vmem [#allocation3], %s806_s11  ;;  %s875_s24 = smul.u32 40, %s1275_s5 }
  0x3e   : > { %s1553_s10 = scalar_select %p1328_p11, 1, 0 }
  0x3f   : > { %s217_s14 = sshll.u32 %s209_s12, 4  ;;  %s876_s7 = smul.u32 640, %s1166_s19  ;;  %s1344_s14 = int_to_ptr.vmem [resolvable:$true] %s217_s14 }
  0x40   : > { %s206_s1 = scalar_lea.sflag [#allocation4], %s1275_s5  ;;  %s990_s23 = scalar_lea.hbm %s1339_s9, 32 }
  0x41   : > { %p991_p3 = scmp.ne.s32.totalorder %s1339_s9, %s990_s23  ;;  %s995_s6 = scalar_lea.hbm %s1529_s0, 96 }
  0x42   : > { %p996_p10 = scmp.lt.u32.totalorder %s1339_s9, %s1529_s0  ;;  %p997_p12 = scmp.lt.u32.totalorder %s995_s6, %s990_s23 }
  0x43   : > { %p993_p6 = pnand %p991_p3, %p1299_p1  ;;  %p999_p2 = scmp.lt.u32.totalorder %s990_s23, %s1339_s9 }
  0x44   : > { %p998_p0 = por %p997_p12, %p996_p10 }
  0x45   : > { %p994_p7 = pneg %p993_p6 }
  0x46   : > { %p1000_p4 = por %p999_p2, %p998_p0 }
  0x48   : > { %p1001_p5 = pnand %p1000_p4, %p994_p7 }
  0x4a   : > { %1004 = shalt.err (!%p1001_p5)
}
  0x4b   : > { %s1005_s12 = scalar_lea.vmem %s1344_s14, 32  ;;  %s1175_s13 = smov [#allocation3]  }
  0x4c   : > { %p1006_p8 = scmp.ne.s32.totalorder %s1344_s14, %s1005_s12  ;;  %s1010_s26 = sshll.u32 %s1175_s13, 4  ;;  %s1011_s26 = int_to_ptr.vmem [resolvable:$false] %s1010_s26 }
  0x4d   : > { %s1012_s17 = scalar_lea.vmem %s1011_s26, 64  ;;  %p1013_p6 = scmp.lt.s32.totalorder %s1344_s14, %s1011_s26 }
  0x4e   : > { %p1008_p9 = pnand %p1006_p8, %p1299_p1  ;;  %p1014_p11 = scmp.lt.s32.totalorder %s1012_s17, %s1005_s12 }
  0x50   : > { %p1009_p3 = pneg %p1008_p9  ;;  %p1015_p10 = por %p1014_p11, %p1013_p6 }
  0x52   : > { %p1016_p12 = pnand %p1015_p10, %p1009_p3 }
  0x54   : > { %1019 = shalt.err (!%p1016_p12)
}
  0x55   : > { %891 = dma.hbm_to_vmem [thread:$0]  (!%p1281_p13), %s1339_s9, 32, %s1344_s14, %s206_s1  }
  0x56   : > { %s1374_s6 = scalar_lea.hbm %s1531_s2, %s876_s7  ;;  %s250_s12 = scalar_lea.vmem [#allocation8], %s875_s24 }
  0x57   : > { %s259_s13 = sshll.u32 %s250_s12, 4  ;;  %s1020_s26 = scalar_lea.hbm %s1374_s6, 640  ;;  %s1378_s13 = int_to_ptr.vmem [resolvable:$true] %s259_s13 }
  0x58   : > { %p1021_p11 = scmp.ne.s32.totalorder %s1374_s6, %s1020_s26  ;;  %s1025_s14 = scalar_lea.hbm %s1531_s2, 1920 }
  0x59   : > { %p1026_p2 = scmp.lt.u32.totalorder %s1374_s6, %s1531_s2  ;;  %p1027_p4 = scmp.lt.u32.totalorder %s1025_s14, %s1020_s26 }
  0x5a   : > { %p1023_p7 = pnand %p1021_p11, %p1299_p1  ;;  %p1029_p8 = scmp.lt.u32.totalorder %s1020_s26, %s1374_s6 }
  0x5b   : > { %p1028_p5 = por %p1027_p4, %p1026_p2 }
  0x5c   : > { %p1024_p0 = pneg %p1023_p7 }
  0x5d   : > { %p1030_p9 = por %p1029_p8, %p1028_p5 }
  0x5f   : > { %p1031_p3 = pnand %p1030_p9, %p1024_p0 }
  0x61   : > { %1034 = shalt.err (!%p1031_p3)
}
  0x62   : > { %s1035_s24 = scalar_lea.vmem %s1378_s13, 640  ;;  %s1176_s23 = smov [#allocation8]  }
  0x63   : > { %p1036_p6 = scmp.ne.s32.totalorder %s1378_s13, %s1035_s24  ;;  %s1040_s29 = sshll.u32 %s1176_s23, 4  ;;  %s1041_s29 = int_to_ptr.vmem [resolvable:$false] %s1040_s29 }
  0x64   : > { %s1042_s12 = scalar_lea.vmem %s1041_s29, 1280  ;;  %p1043_p11 = scmp.lt.s32.totalorder %s1378_s13, %s1041_s29 }
  0x65   : > { %p1038_p10 = pnand %p1036_p6, %p1299_p1  ;;  %p1044_p7 = scmp.lt.s32.totalorder %s1042_s12, %s1035_s24 }
  0x67   : > { %p1039_p12 = pneg %p1038_p10  ;;  %p1045_p2 = por %p1044_p7, %p1043_p11 }
  0x69   : > { %p1046_p4 = pnand %p1045_p2, %p1039_p12 }
  0x6b   : > { %1049 = shalt.err (!%p1046_p4)
}
  0x6c   : > { %s1554_s26 = smov 8   ;;  %s1555_s1 = smov 128  }
  0x6d   : > { %897 = dma.hbm_to_vmem [thread:$0]  (!%p1281_p13), %s1374_s6, 640, %s1378_s13, %s1293_s22, %s1555_s1, %s1555_s1, %s1554_s26  }
  0x6e   : > { %s1556_s9 = sshll.u32 %s1166_s19, 5  ;;  %s273_s24 = scalar_lea.vmem [#allocation9], %s806_s11 }
  0x6f   : > { %s1410_s17 = scalar_lea.hbm %s1532_s3, %s1556_s9  ;;  %s282_s23 = sshll.u32 %s273_s24, 4  ;;  %s283_s23 = int_to_ptr.vmem [resolvable:$true] %s282_s23 }
  0x70   : > { %s270_s29 = scalar_lea.sflag [#allocation10], %s1275_s5  ;;  %s1050_s12 = scalar_lea.hbm %s1410_s17, 32 }
  0x71   : > { %p1051_p0 = scmp.ne.s32.totalorder %s1410_s17, %s1050_s12  ;;  %s1055_s13 = scalar_lea.hbm %s1532_s3, 96 }
  0x72   : > { %p1056_p9 = scmp.lt.u32.totalorder %s1410_s17, %s1532_s3  ;;  %p1057_p3 = scmp.lt.u32.totalorder %s1055_s13, %s1050_s12 }
  0x73   : > { %p1053_p5 = pnand %p1051_p0, %p1299_p1  ;;  %p1059_p10 = scmp.lt.u32.totalorder %s1050_s12, %s1410_s17 }
  0x74   : > { %p1058_p6 = por %p1057_p3, %p1056_p9 }
  0x75   : > { %p1054_p8 = pneg %p1053_p5 }
  0x76   : > { %p1060_p12 = por %p1059_p10, %p1058_p6 }
  0x78   : > { %p1061_p11 = pnand %p1060_p12, %p1054_p8 }
  0x7a   : > { %1064 = shalt.err (!%p1061_p11)
}
  0x7b   : > { %s1065_s5 = scalar_lea.vmem %s283_s23, 32  ;;  %s1177_s11 = smov [#allocation9]  }
  0x7c   : > { %p1066_p7 = scmp.ne.s32.totalorder %s283_s23, %s1065_s5  ;;  %s1070_s9 = sshll.u32 %s1177_s11, 4  ;;  %s1071_s9 = int_to_ptr.vmem [resolvable:$false] %s1070_s9 }
  0x7d   : > { %s1072_s14 = scalar_lea.vmem %s1071_s9, 64  ;;  %p1073_p0 = scmp.lt.s32.totalorder %s283_s23, %s1071_s9 }
  0x7e   : > { %p1068_p2 = pnand %p1066_p7, %p1299_p1  ;;  %p1074_p5 = scmp.lt.s32.totalorder %s1072_s14, %s1065_s5 }
  0x80   : > { %p1069_p4 = pneg %p1068_p2  ;;  %p1075_p13 = por %p1074_p5, %p1073_p0 }
  0x82   : > { %p1076_p3 = pnand %p1075_p13, %p1069_p4 }
  0x84   : > { %1079 = shalt.err (!%p1076_p3)
}
  0x85   : > { %p1557_p9 = scmp.ne.s32.totalorder %s1550_s8, 0  ;;  %p1558_p8 = scmp.ne.s32.totalorder %s1553_s10, 0 }
  0x86   : > { %s1435_s25 = sand.u32 (!%p1558_p8), 1, %s1154_s16   ;;  %p1559_p13 = scmp.ne.s32.totalorder (!%p1558_p8), %s1546_s27, 0 }
  0x87   : > { %900 = dma.hbm_to_vmem [thread:$0]  (!%p1557_p9), %s1410_s17, 32, %s283_s23, %s270_s29  }
  0x88   : > { %291 = sbr.rel (%p1558_p8) target bundleno = 613 (0x265), region = 36  ;;  %s1438_s7 = sshll.u32 (!%p1558_p8), %s1435_s25, 1 }
  0x89   : > { %s294_s24 = scalar_lea.sflag (!%p1558_p8), [#allocation4], %s1435_s25  ;;  %s297_s12 = scalar_lea.vmem (!%p1558_p8), [#allocation3], %s1438_s7 }
  0x8f   : > { %1133 = dma.done.wait (%p1559_p13), %s294_s24, 32  }
  0x90   : > { %1135 = vsyncadd (%p1559_p13), %s294_s24, 4294967264  ;;  %s302_s8 = sand.u32 1, %s1238_s21   ;;  %s816_s10 = sshll.u32 %s1435_s25, 4 }
  0x91   : > { %s303_s17 = scalar_lea.sflag [#allocation7], %s302_s8  ;;  %s306_s23 = scalar_lea.vmem [#allocation6], %s816_s10 }
  0x92   : > { %1137 = dma.done.wait (%p1559_p13), %s303_s17, 896  }
  0x93   : > { %1139 = vsyncadd (%p1559_p13), %s303_s17, 4294966400  ;;  %s877_s29 = smul.u32 40, %s1435_s25  ;;  %s321_s6 = scalar_lea.sflag [#allocation10], %s1435_s25 }
  0x94   : > { %s324_s13 = scalar_lea.vmem [#allocation9], %s1438_s7 }
  0x95   : > { %s1453_s22 = scalar_lea.vmem [#allocation8], %s877_s29 }
  0x96   : > { %1141 = dma.done.wait (%p1559_p13), %s321_s6, 32  }
  0x97   : > { %1143 = vsyncadd (%p1559_p13), %s321_s6, 4294967264  ;;  %v1178_v0 = vmov 0.0|0.0   ;;  %vm1179_vm0 = vmmov 0   ;;  %v1180_v1 = vmov 0.0   ;;  %v449_v2 = vlaneseq  ;;  %v372_v7 = vld [vmem:[%s306_s23] sm:$0xff]  ;;  %v373_v8 = vld [vmem:[%s306_s23 + $0x8] sm:$0xff] }
  0x98   : > { %866 = vmatprep.subr.bf16.mxu0 %v1178_v0  ;;  %845 = vmatprep.mubr.msk.f32.mxu0 %vm1179_vm0, %v1180_v1  ;;  %v867_v10 = vpack.c.bf16 %v373_v8, %v372_v7  ;;  %v541_v11 = vld [vmem:[%s1453_s22] sm:$0xff]  ;;  %v542_v12 = vld [vmem:[%s1453_s22 + $0x8] sm:$0xff]  ;;  %v371_v14 = vld [vmem:[%s297_s12] sm:$0x3]  ;;  %vm374_vm3 = vcmask 130048   ;;  %vm465_vm5 = vcmask 1043456  }
  0x99   : > { %869 = vmatprep.subr.bf16.mxu1 %v1178_v0  ;;  %863 = vmatprep.mubr.msk.f32.mxu1 %vm1179_vm0, %v1180_v1  ;;  %v450_v3 = vshrl.u32 %v449_v2, 7  ;;  %v452_v4 = vand.u32 127, %v449_v2  ;;  %v870_v13 = vpack.c.bf16 %v542_v12, %v541_v11  ;;  %v448_v16 = vld [vmem:[%s324_s13] sm:$0x3]  ;;  %vm461_vm6 = vcmask 31744   ;;  %v544_v18 = vld [vmem:[%s1453_s22 + $0x18] sm:$0xff] }
  0x9a   : > { %868 = vmatpush3.bf16.msra.mxu0 %v867_v10  ;;  %v543_v17 = vld [vmem:[%s1453_s22 + $0x10] sm:$0xff]  ;;  %v545_v20 = vld [vmem:[%s1453_s22 + $0x20] sm:$0xf]  ;;  %vm369_vm7 = vcmask 58368   ;;  %vm546_vm8 = vcmask 293888   ;;  %s826_s21 = sshll.u32 %s1162_s18, 5 }
  0x9b   : > { %v453_v5 = vmul.u32 9, %v450_v3  ;;  %v455_v6 = vadd.s32 1, %v450_v3  ;;  %848 = vmatprep.subr.mxu0 %v1180_v1  ;;  %871 = vmatpush3.bf16.msra.mxu1 %v870_v13  ;;  %v873_v19 = vpack.c.bf16 %v544_v18, %v543_v17  ;;  %370 = vst.msk [vmem:[#allocation2] sm:$0x3] %vm369_vm7, %v1180_v1  ;;  %s363_s27 = scalar_lea.vmem [#allocation11], %s1438_s7  ;;  %s1480_s11 = scalar_lea.hbm %s1533_s4, %s826_s21 }
  0x9c   : > { %872 = vmatprep.subr.bf16.mxu1 %v1178_v0  ;;  %s646_s26 = sshll.u32 %s363_s27, 4  ;;  %s632_s9 = scalar_lea.sflag [#allocation5], %s1435_s25  ;;  %s1482_s26 = int_to_ptr.vmem [resolvable:$true] %s646_s26 }
  0x9d   : > { %vm454_vm1 = vcmp.ge.s32.totalorder %v452_v4, %v453_v5  ;;  %v456_v9 = vmul.u32 9, %v455_v6  ;;  %846 = vmatmul.mubr.msk.f32.vlgmr.msra.gmra.mrb[0].mxu0 %vm374_vm3, %v371_v14  ;;  %s1080_s14 = scalar_lea.vmem %s1482_s26, 32  ;;  %p1560_p6 = scmp.ne.s32.totalorder %s1547_s28, 0 }
  0x9e   : > { %850 = vmatprep.mubr.msk.f32.mxu0 %vm1179_vm0, %v1180_v1  ;;  %p1081_p1 = scmp.ne.s32.totalorder %s1482_s26, %s1080_s14  ;;  %s1181_s18 = smov [#allocation11]  }
  0x9f   : > { %vm457_vm2 = vcmp.lt.s32.totalorder %v452_v4, %v456_v9  ;;  %874 = vmatpush3.bf16.msra.mxu1 %v873_v19  ;;  %s1084_s7 = sshll.u32 %s1181_s18, 4  ;;  %s1085_s7 = int_to_ptr.vmem [resolvable:$false] %s1084_s7 }
  0xa0   : > { %vm458_vm4 = vmand %vm454_vm1, %vm457_vm2  ;;  %861 = vmatprep.subr.mxu1 %v1180_v1  ;;  %p1082_p10 = pnand %p1081_p1, %p1560_p6  ;;  %s1086_s24 = scalar_lea.vmem %s1085_s7, 64 }
  0xa1   : > { %v820_v15 = vsel %vm458_vm4, 1.0, %v1180_v1  ;;  %p1087_p11 = scmp.lt.s32.totalorder %s1482_s26, %s1085_s7  ;;  %p1088_p7 = scmp.lt.s32.totalorder %s1086_s24, %s1080_s14 }
  0xa2   : > { %849 = vmatpush3.msk.msra.mxu0 %vm465_vm5, %v820_v15  ;;  %v540_v26 = vld [vmem:[#allocation2] sm:$0x3]  ;;  %p1083_p12 = pneg %p1082_p10 }
  0xa3   : > { %851 = vmatmul.mubr.msk.f32.vlgmr.msra.gmra.mrb[2].mxu0 %vm461_vm6, %v448_v16  ;;  %862 = vmatpush3.msk.msra.mxu1 %vm465_vm5, %v545_v20  ;;  %p1089_p2 = por %p1088_p7, %p1087_p11 }
  0xa5   : > { %p1090_p4 = pnand %p1089_p2, %p1083_p12 }
 0x170   : > { %v444_v21 = vpop.f32.mrb[0].mxu0 }
 0x171   : > { %v847_v22 = vpop.f32.mrb[1].mxu0 }
 0x176   : > { %v535_v23 = vpop.f32.mrb[2].mxu0 }
 0x177   : > { %v539_v24 = vmul.f32 %v535_v23, %v444_v21  ;;  %v852_v25 = vpop.f32.mrb[3].mxu0 }
 0x179   : > { %864 = vmatmul.mubr.msk.f32.vlgmr.msra.gmra.mrb[0].mxu1 %vm546_vm8, %v539_v24 }
 0x24c   : > { %v619_v27 = vpop.f32.mrb[0].mxu1 }
 0x24d   : > { %v623_v28 = vadd.f32 %v619_v27, %v540_v26  ;;  %v865_v29 = vpop.f32.mrb[1].mxu1 }
 0x24f   : > { %625 = vst.msk [vmem:[#allocation2] sm:$0x3] %vm369_vm7, %v623_v28 }
 0x256   : > { %v629_v30 = vld [vmem:[#allocation2] sm:$0x3] }
 0x257   : > { %630 = vst.msk [vmem:[%s363_s27] sm:$0x3] %vm369_vm7, %v629_v30 }
 0x258   : > { %1093 = shalt.err (!%p1090_p4)
}
 0x259   : > { %s1094_s25 = scalar_lea.hbm %s1480_s11, 32  ;;  %s1098_s10 = scalar_lea.hbm %s1533_s4, 96 }
 0x25a   : > { %p1095_p0 = scmp.ne.s32.totalorder %s1480_s11, %s1094_s25  ;;  %p1099_p9 = scmp.lt.u32.totalorder %s1480_s11, %s1533_s4 }
 0x25b   : > { %p1100_p8 = scmp.lt.u32.totalorder %s1098_s10, %s1094_s25  ;;  %p1102_p1 = scmp.lt.u32.totalorder %s1094_s25, %s1480_s11 }
 0x25c   : > { %p1096_p5 = pnand %p1095_p0, %p1560_p6 }
 0x25d   : > { %p1101_p13 = por %p1100_p8, %p1099_p9 }
 0x25e   : > { %p1097_p3 = pneg %p1096_p5 }
 0x25f   : > { %p1103_p10 = por %p1102_p1, %p1101_p13 }
 0x261   : > { %p1104_p12 = pnand %p1103_p10, %p1097_p3 }
 0x263   : > { %1107 = shalt.err (!%p1104_p12)
}
 0x264   : > { %886 = dma.vmem_to_hbm [thread:$0]  (%p1560_p6), %s1482_s26, 32, %s1480_s11, %s632_s9  }
 0x265 PF: > { %p906_p11 = scmp.ge.s32.totalorder %s1170_s20, 2  ;;  %s658_s29 = sand.u32 1, %s1150_s15  }
 0x266   : > { %p1561_p7 = scmp.ne.s32.totalorder %s1549_s30, 0  ;;  %s659_s22 = scalar_lea.sflag [#allocation5], %s658_s29 }
 0x268   : > { %p902_p2 = pnand %p906_p11, %p1561_p7 }
 0x26a   : > { %1145 = dma.done.wait (!%p902_p2), %s659_s22, 32  }
 0x26b   : > { %1147 = vsyncadd (!%p902_p2), %s659_s22, 4294967264  ;;  %s26_s20 = sadd.s32 1, %s1170_s20   ;;  %s1562_s6 = sld [smem:[#allocation16_spill]] }
 0x26c   : > { %p23_p4 = scmp.ge.s32.totalorder %s26_s20, 5   ;;  %s1563_s17 = sld [smem:[#allocation18_spill]] }
 0x26d   : > { %s1564_s28 = sld [smem:[#allocation17_spill]]  ;;  %s1565_s15 = smov %s1154_s16 }
 0x26e   : > { %s1567_s18 = smov %s1166_s19  ;;  %25 = sbr.rel (!%p23_p4) target bundleno = 12 (0xc), region = 126 }
 0x271   : > { %s1566_s16 = smov %s1562_s6 }
 0x273   : > { %s1568_s19 = smov %s1564_s28 }
 0x275   :  { %664 = vsyncpa [#allocation4], 1 }
 0x276   :  { %666 = vsyncpa [#allocation4 + $0x1], 1 }
 0x277   :  { %667 = vsyncpa [#allocation7], 1 }
 0x278   :  { %669 = vsyncpa [#allocation7 + $0x1], 1 }
 0x279   :  { %670 = vsyncpa [#allocation10], 1 }
 0x27a   :  { %672 = vsyncpa [#allocation10 + $0x1], 1 }
 0x27b   :  { %673 = vsyncpa [#allocation5], 1 }
 0x27c   :  { %675 = vsyncpa [#allocation5 + $0x1], 1 }

</bundles_post_ra>
